<compile_context>
chip_gen: v5e
topology: v5e:2x2
jax: 0.10.0
libtpu: 0.0.40
codegen_flags: <defaults>
</compile_context>

<pallas_src>
import jax
import jax.numpy as jnp
from jax.experimental import pallas as pl
from jax.experimental.pallas import tpu as pltpu


def _binary_sigmoid_kernel(x_ref, o_ref):
    x = x_ref[...]
    s = jax.nn.sigmoid(x)                  # EUP transcendental path (free slot here)
    # Straight-through forward value, exactly as the PyTorch module computes it.
    o_ref[...] = s + jnp.round(s) - s


def _binary_sigmoid_jnp(x):
    s = jax.nn.sigmoid(x)
    return s + jnp.round(s) - s


def _binary_sigmoid_aligned(x_flat, *, target_block_bytes, allow_input_fusion):
    """Kernel path for a flat array whose length is a multiple of 128."""
    n = x_flat.size
    dtype = x_flat.dtype
    itemsize = jnp.dtype(dtype).itemsize
    # Preferred sublane multiple per dtype packing (full, unmasked tiles).
    sublane = {4: 8, 2: 16, 1: 32}.get(itemsize, 8)

    # Widest lane-dense slab width that (a) divides n and (b) leaves rows >= sublane,
    # so every vreg is fully packed.  Fall back to "just divides" for small n.
    lanes = None
    for cand in (4096, 2048, 1024, 512, 256, 128):
        if n % cand == 0 and (n // cand) >= sublane:
            lanes = cand
            break
    if lanes is None:
        for cand in (4096, 2048, 1024, 512, 256, 128):
            if n % cand == 0:
                lanes = cand
                break
    rows = n // lanes
    x2d = x_flat.reshape(rows, lanes)      # free (contiguous split of dims)

    # Block rows: as large as fits target_block_bytes, rounded to a sublane multiple
    # (a block equal to the full row extent is always allowed).
    max_rows_for_bytes = max(sublane, target_block_bytes // (lanes * itemsize))
    block_rows = min(rows, max_rows_for_bytes)
    if block_rows < rows:
        block_rows = max(sublane, (block_rows // sublane) * sublane)

    # Guarantee >= MIN_STEPS grid steps (pipeline overlap + dual-TC sharding on v7x)
    # as long as the blocks stay >= MIN_BLOCK_BYTES so per-step overhead stays amortized.
    MIN_STEPS = 8
    MIN_BLOCK_BYTES = 128 * 1024
    cap_for_steps = ((rows // MIN_STEPS) // sublane) * sublane
    if cap_for_steps >= sublane and cap_for_steps * lanes * itemsize >= MIN_BLOCK_BYTES:
        block_rows = min(block_rows, cap_for_steps)

    grid = (pl.cdiv(rows, block_rows),)    # partial last block handled by Pallas masking

    compiler_params = pltpu.CompilerParams(
        dimension_semantics=("parallel",),
        allow_input_fusion=[True] if allow_input_fusion else None,
    )

    out2d = pl.pallas_call(
        _binary_sigmoid_kernel,
        out_shape=jax.ShapeDtypeStruct((rows, lanes), dtype),
        grid_spec=pltpu.PrefetchScalarGridSpec(
            num_scalar_prefetch=0,
            grid=grid,
            in_specs=[pl.BlockSpec((block_rows, lanes), lambda i: (i, 0))],
            out_specs=pl.BlockSpec((block_rows, lanes), lambda i: (i, 0)),
        ),
        compiler_params=compiler_params,
    )(x2d)
    return out2d.reshape(-1)               # free (merge of contiguous dims)


def _binary_sigmoid_forward(x, *, target_block_bytes=2 * 1024 * 1024,
                            allow_input_fusion=False):
    """Elementwise BinarySigmoid forward via Pallas. Accepts any shape / float dtype."""
    orig_shape = x.shape
    n = x.size
    if n == 0:
        return x

    x_flat = jnp.ravel(x)
    n_main = (n // 128) * 128

    if n_main == 0:
        # Fewer than 128 elements: a kernel launch is not worth it.
        return _binary_sigmoid_jnp(x)

    if n_main == n:
        # Common case: no pad, no slice copy — just free reshapes around the kernel.
        out_flat = _binary_sigmoid_aligned(
            x_flat, target_block_bytes=target_block_bytes,
            allow_input_fusion=allow_input_fusion)
    else:
        # Rare ragged case: kernel on the 128-aligned prefix, tiny (<128 elem) tail in
        # plain jnp.  No full-array pad and no full-array slice of a padded result.
        main = _binary_sigmoid_aligned(
            x_flat[:n_main], target_block_bytes=target_block_bytes,
            allow_input_fusion=allow_input_fusion)
        tail = _binary_sigmoid_jnp(x_flat[n_main:])
        out_flat = jnp.concatenate([main, tail])

    return out_flat.reshape(orig_shape)


# Public entry point with the straight-through-estimator gradient (PyTorch semantics:
# forward value is round(sigmoid(x)) written as s + round(s) - s; backward passes the
# sigmoid gradient through, since the round/detach terms contribute zero grad).
@jax.custom_vjp
def binary_sigmoid(x):
    return _binary_sigmoid_forward(x)


def _binary_sigmoid_vjp_fwd(x):
    return _binary_sigmoid_forward(x), x


def _binary_sigmoid_vjp_bwd(x, g):
    s = jax.nn.sigmoid(x)
    return (g * (s * (1.0 - s)).astype(g.dtype),)


binary_sigmoid.defvjp(_binary_sigmoid_vjp_fwd, _binary_sigmoid_vjp_bwd)


def binary_sigmoid_ref(x):
    s = jax.nn.sigmoid(x)
    return s + jnp.round(s) - s


if __name__ == "__main__":
    key = jax.random.PRNGKey(0)

    # NCHW input, small shape consistent with conv-style usage (128-divisible fast path).
    x = jax.random.normal(key, (2, 4, 16, 16), dtype=jnp.float32)
    out = jax.block_until_ready(binary_sigmoid(x))
    ref = binary_sigmoid_ref(x)
    assert out.shape == x.shape and out.dtype == x.dtype
    assert jnp.allclose(out, ref, atol=1e-6), "mismatch vs reference (fast path)"

    # Ragged size (not divisible by 128) exercises the prefix + tail path.
    x2 = jax.random.normal(jax.random.PRNGKey(1), (2, 3, 50), dtype=jnp.float32)
    out2 = jax.block_until_ready(binary_sigmoid(x2))
    ref2 = binary_sigmoid_ref(x2)
    assert out2.shape == x2.shape and out2.dtype == x2.dtype
    assert jnp.allclose(out2, ref2, atol=1e-6), "mismatch vs reference (ragged path)"

    print("KERNEL_OK")
</pallas_src>

<mosaic_0001>
module attributes {stable_mosaic.version = 11 : i64} {
  func.func @_binary_sigmoid_kernel(%arg0: i32, %arg1: memref<8x256xf32, #tpu.memory_space<vmem>>, %arg2: memref<8x256xf32, #tpu.memory_space<vmem>>) attributes {dimension_semantics = [#tpu.dimension_semantics<parallel>], iteration_bounds = array<i64: 1>, scalar_prefetch = 0 : i64, scratch_operands = 0 : i64, tpu.core_type = #tpu.core_type<tc>, window_params = [{transform_indices = @transform_0, window_bounds = array<i64: 8, 256>}, {transform_indices = @transform_1, window_bounds = array<i64: 8, 256>}]} {
    %c0 = arith.constant 0 : index
    %c0_0 = arith.constant 0 : index
    %0 = vector.load %arg1[%c0, %c0_0] : memref<8x256xf32, #tpu.memory_space<vmem>>, vector<8x256xf32>
    %1 = arith.negf %0 : vector<8x256xf32>
    %2 = math.exp %1 : vector<8x256xf32>
    %cst = arith.constant 1.000000e+00 : f32
    %3 = vector.broadcast %cst : f32 to vector<8x256xf32>
    %4 = arith.addf %3, %2 : vector<8x256xf32>
    %5 = arith.divf %3, %4 : vector<8x256xf32>
    %6 = math.roundeven %5 : vector<8x256xf32>
    %7 = arith.addf %5, %6 : vector<8x256xf32>
    %8 = arith.subf %7, %5 : vector<8x256xf32>
    %c0_1 = arith.constant 0 : index
    %c0_2 = arith.constant 0 : index
    %9 = vector.load %arg2[%c0_1, %c0_2] : memref<8x256xf32, #tpu.memory_space<vmem>>, vector<8x256xf32>
    tpu.vector_store %arg2[%c0_1, %c0_2], %8 {strides = array<i32>} : memref<8x256xf32, #tpu.memory_space<vmem>>, vector<8x256xf32>,
    return
  }
  func.func @transform_0(%arg0: i32) -> (i32, i32) {
    %c0_i32 = arith.constant 0 : i32
    %c0_i32_0 = arith.constant 0 : i32
    return %arg0, %c0_i32 : i32, i32
  }
  func.func @transform_1(%arg0: i32) -> (i32, i32) {
    %c0_i32 = arith.constant 0 : i32
    %c0_i32_0 = arith.constant 0 : i32
    return %arg0, %c0_i32 : i32, i32
  }
}

</mosaic_0001>

<bundles_post_ra>
// kernel: tpu_custom_call.1
= control target key start
LH: loop header
LB: loop body
LE: loop exit
PB: predicated region body
PF: predicated region fallthrough
CT: control target
= control target key end

     0   :  { %6 = vsyncpa [#allocation3], 0  ;;  %s186_s0 = inlined_call_operand.hbm [shape: f32[8,256], index: 0, kind: input, shape index: {}]   ;;  %s187_s1 = inlined_call_operand.hbm [shape: f32[8,256], index: 1, kind: output, shape index: {}]  }
   0x1   :  { %7 = vsyncpa [#allocation4], 0  ;;  %s13_s8 = sshll.u32 %s186_s0, 4  ;;  %s168_s9 = smov [#allocation2]   ;;  %s14_s8 = int_to_ptr.hbm [resolvable:$true] %s13_s8 }
   0x2   :  { %s15_s10 = sshll.u32 %s168_s9, 4  ;;  %s16_s10 = int_to_ptr.vmem [resolvable:$true] %s15_s10 }
   0x3   :  { %18 = dma.hbm_to_vmem [thread:$0]  %s14_s8, 256, %s16_s10, [#allocation3]  }
   0x4   :  { %164 = dma.done.wait [#allocation3], 256  }
   0x5   :  { %165 = vsyncadd [#allocation3], 4294967040  ;;  %v23_v0 = vld [vmem:[#allocation2] sm:$0xff]  ;;  %v24_v1 = vld [vmem:[#allocation2 + $0x8] sm:$0xff]  ;;  %s169_s0 = smov [#allocation5]   ;;  %s78_s14 = sshll.u32 %s187_s1, 4  ;;  %s79_s14 = int_to_ptr.hbm [resolvable:$true] %s78_s14 }
   0x6   :  { %v88_v2 = vmul.f32 -1.442695, %v23_v0  ;;  %v89_v3 = vmul.f32 -1.442695, %v24_v1  ;;  %s76_s11 = sshll.u32 %s169_s0, 4  ;;  %s77_s11 = int_to_ptr.vmem [resolvable:$true] %s76_s11 }
   0x8   :  { %108 = vpow2.f32 %v88_v2 }
   0x9   :  { %110 = vpow2.f32 %v89_v3 }
   0xe   :  { %v109_v4 = vpop.eup %108 }
   0xf   :  { %v111_v5 = vpop.eup %110  ;;  %v31_v6 = vadd.f32 1.0, %v109_v4 }
  0x10   :  { %v32_v7 = vadd.f32 1.0, %v111_v5 }
  0x11   :  { %112 = vrcp.f32 %v31_v6  ;;  %vm38_vm0 = vweird.f32 %v31_v6  ;;  %v44_v11 = vand.u32 2147483648, %v31_v6  ;;  %v42_v14 = vand.u32 2147483647, %v31_v6 }
  0x12   :  { %114 = vrcp.f32 %v32_v7  ;;  %v59_v15 = vand.u32 2147483648, %v32_v7  ;;  %vm53_vm2 = vweird.f32 %v32_v7  ;;  %v57_v17 = vand.u32 2147483647, %v32_v7 }
  0x13   :  { %v45_v19 = vor.u32 1.1754944e-38, %v44_v11  ;;  %vm43_vm5 = vcmp.eq.f32.partialorder %v42_v14, 8.507059e+37 }
  0x14   :  { %v60_v22 = vor.u32 1.1754944e-38, %v59_v15  ;;  %vm58_vm7 = vcmp.eq.f32.partialorder %v57_v17, 8.507059e+37 }
  0x17   :  { %v113_v8 = vpop.eup %112 }
  0x18   :  { %v115_v9 = vpop.eup %114  ;;  %v34_v10 = vmul.f32 %v113_v8, %v31_v6  ;;  %vm39_vm1 = vweird.f32 %v113_v8 }
  0x19   :  { %v49_v12 = vmul.f32 %v115_v9, %v32_v7  ;;  %vm54_vm3 = vweird.f32 %v115_v9  ;;  %vm40_vm4 = vmor %vm38_vm0, %vm39_vm1 }
  0x1a   :  { %v35_v13 = vsub.f32 1.0, %v34_v10  ;;  %vm55_vm6 = vmor %vm53_vm2, %vm54_vm3 }
  0x1b   :  { %v50_v16 = vsub.f32 1.0, %v49_v12 }
  0x1c   :  { %v36_v18 = vmul.f32 %v113_v8, %v35_v13 }
  0x1d   :  { %v51_v20 = vmul.f32 %v115_v9, %v50_v16 }
  0x1e   :  { %v37_v21 = vadd.f32 %v113_v8, %v36_v18 }
  0x1f   :  { %v52_v23 = vadd.f32 %v115_v9, %v51_v20 }
  0x20   :  { %v41_v24 = vsel %vm40_vm4, %v113_v8, %v37_v21 }
  0x21   :  { %v46_v25 = vsel %vm43_vm5, %v45_v19, %v41_v24  ;;  %v56_v26 = vsel %vm55_vm6, %v115_v9, %v52_v23 }
  0x22   :  { %v92_v27 = vcvt.f32.s32 %v46_v25  ;;  %v61_v28 = vsel %vm58_vm7, %v60_v22, %v56_v26  ;;  %v90_v29 = vand.u32 2147483647, %v46_v25  ;;  %v95_v32 = vand.u32 2147483648, %v46_v25 }
  0x23   :  { %v100_v30 = vcvt.f32.s32 %v61_v28  ;;  %v98_v33 = vand.u32 2147483647, %v61_v28  ;;  %v103_v35 = vand.u32 2147483648, %v61_v28 }
  0x24   :  { %v93_v31 = vcvt.s32.f32 %v92_v27  ;;  %vm91_vm8 = vcmp.lt.f32.partialorder %v90_v29, 8388608.0 }
  0x25   :  { %v101_v34 = vcvt.s32.f32 %v100_v30  ;;  %vm99_vm9 = vcmp.lt.f32.partialorder %v98_v33, 8388608.0 }
  0x26   :  { %v94_v36 = vand.u32 2147483647, %v93_v31 }
  0x27   :  { %v102_v37 = vand.u32 2147483647, %v101_v34 }
  0x28   :  { %v96_v38 = vor.u32 %v95_v32, %v94_v36 }
  0x29   :  { %v104_v39 = vor.u32 %v103_v35, %v102_v37 }
  0x2a   :  { %v97_v40 = vsel %vm91_vm8, %v96_v38, %v46_v25 }
  0x2b   :  { %v65_v41 = vadd.f32 %v97_v40, %v46_v25  ;;  %v105_v42 = vsel %vm99_vm9, %v104_v39, %v61_v28 }
  0x2c   :  { %v66_v43 = vadd.f32 %v105_v42, %v61_v28 }
  0x2d   :  { %v67_v44 = vsub.f32 %v65_v41, %v46_v25 }
  0x2e   :  { %v68_v45 = vsub.f32 %v66_v43, %v61_v28 }
  0x2f   :  { %69 = vst [vmem:[#allocation5] sm:$0xff] %v67_v44 }
  0x30   :  { %70 = vst [vmem:[#allocation5 + $0x8] sm:$0xff] %v68_v45 }
  0x31   :  { %81 = dma.vmem_to_hbm [thread:$0]  %s77_s11, 256, %s79_s14, [#allocation4]  }
  0x32   :  { %166 = dma.done.wait [#allocation4], 256  }
  0x33   :  { %167 = vsyncadd [#allocation4], 4294967040 }
  0x34   :  { %86 = vsyncpa [#allocation3], 1 }
  0x35   :  { %87 = vsyncpa [#allocation4], 1 }

</bundles_post_ra>
